<compile_context>
chip_gen: v7x
topology: tpu7x:2x2x1
jax: 0.10.0
libtpu: 0.0.40
codegen_flags: <defaults>
</compile_context>

<pallas_src>
import functools

import jax
import jax.numpy as jnp
from jax.experimental import pallas as pl
from jax.experimental.pallas import tpu as pltpu

EPS = 1e-5


def resblock_kernel(x_ref, m1_ref, b1_ref, g1_ref, be1_ref,
                    m2_ref, b2_ref, g2_ref, be2_ref,
                    fold_ref, expand_ref, o_ref,
                    *, B, H, W, C, mxu_dtype):
    BH = B * H
    inv_n = 1.0 / float(B * H * W)

    x_ld = x_ref[...].astype(jnp.float32)                 # (B*H, W*C) lane-dense

    # h-position of each row: zeroes vertical taps that cross the top/bottom
    # image border (also kills the batch-boundary wraparound from the roll).
    h_idx = jax.lax.broadcasted_iota(jnp.int32, (BH, 1), 0) % H

    fold = fold_ref[...]                                  # (W*C, C) 0/1 fold matrix
    expand = expand_ref[...]                              # (C, W*C) 0/1 expand matrix

    def conv_bn(inp, m_ref, b_row, g_row, be_row):
        # vertical taps via sublane rotation (XLU) + border masking
        up = jnp.where(h_idx == 0, 0.0, pltpu.roll(inp, shift=1, axis=0))
        dn = jnp.where(h_idx == H - 1, 0.0, pltpu.roll(inp, shift=BH - 1, axis=0))
        a = jnp.concatenate([up, inp, dn], axis=1).astype(mxu_dtype)   # (BH, 3*W*C)

        # single MXU matmul per conv; kw taps + W zero-padding live in m_ref
        y = jnp.dot(a, m_ref[...], preferred_element_type=jnp.float32)  # (BH, W*C)
        y = y + b_row                                       # pre-tiled conv bias

        # fused training-mode BN statistics (per channel over B, H, W)
        s = jnp.dot(jnp.sum(y, axis=0, keepdims=True), fold,
                    preferred_element_type=jnp.float32)     # (1, C)
        ss = jnp.dot(jnp.sum(y * y, axis=0, keepdims=True), fold,
                     preferred_element_type=jnp.float32)    # (1, C)
        mean = s * inv_n
        var = ss * inv_n - mean * mean                      # biased variance
        scale = g_row * jax.lax.rsqrt(var + EPS)            # (1, C)
        shift = be_row - mean * scale                       # (1, C)

        # expand per-channel scale/shift back to the lane-dense layout
        scale_ld = jnp.dot(scale, expand, preferred_element_type=jnp.float32)
        shift_ld = jnp.dot(shift, expand, preferred_element_type=jnp.float32)
        return y * scale_ld + shift_ld

    out1 = jnp.maximum(
        conv_bn(x_ld, m1_ref, b1_ref[...], g1_ref[...], be1_ref[...]), 0.0)
    out2 = conv_bn(out1, m2_ref, b2_ref[...], g2_ref[...], be2_ref[...])
    o_ref[...] = jnp.maximum(out2 + x_ld, 0.0).astype(o_ref.dtype)


def _conv_band_matrix(w_hwio, W, dtype):
    """HWIO (3,3,Cin,Cout) -> (3*W*Cin, W*Cout) banded matrix so a 3x3 'SAME'
    conv becomes  [row(h-1) | row(h) | row(h+1)] @ M  on lane-dense rows."""
    C_in, C_out = w_hwio.shape[2], w_hwio.shape[3]
    wi = jnp.arange(W)[:, None]
    wo = jnp.arange(W)[None, :]
    blocks = []
    for kh in range(3):
        m = jnp.zeros((W * C_in, W * C_out), dtype)
        for kw in range(3):
            sel = (wi == wo + (kw - 1)).astype(dtype)       # (W, W) shift selector
            m = m + jnp.kron(sel, w_hwio[kh, kw].astype(dtype))
        blocks.append(m)
    return jnp.concatenate(blocks, axis=0)


def residual_block(x, w1, b1, g1, be1, w2, b2, g2, be2, *, mxu_dtype=jnp.float32):
    # mxu_dtype=jnp.bfloat16 gives full-rate MXU on v6e/v7x (f32 accumulation);
    # elementwise/BN math stays f32 in all cases (required on v5e).
    B, H, W, C = x.shape
    BH, WC = B * H, W * C

    x_ld = x.reshape(BH, WC)                               # lane-dense activations
    m1 = _conv_band_matrix(w1, W, mxu_dtype)
    m2 = _conv_band_matrix(w2, W, mxu_dtype)
    b1_t = jnp.tile(b1.reshape(1, C), (1, W)).astype(jnp.float32)
    b2_t = jnp.tile(b2.reshape(1, C), (1, W)).astype(jnp.float32)
    g1_r, be1_r = g1.reshape(1, C).astype(jnp.float32), be1.reshape(1, C).astype(jnp.float32)
    g2_r, be2_r = g2.reshape(1, C).astype(jnp.float32), be2.reshape(1, C).astype(jnp.float32)
    eye = jnp.eye(C, dtype=jnp.float32)
    fold = jnp.tile(eye, (W, 1))                           # (W*C, C): lane-block -> channel
    expand = jnp.tile(eye, (1, W))                         # (C, W*C): channel -> lane-block

    kernel = functools.partial(resblock_kernel, B=B, H=H, W=W, C=C,
                               mxu_dtype=mxu_dtype)
    out_ld = pl.pallas_call(
        kernel,
        out_shape=jax.ShapeDtypeStruct((BH, WC), x.dtype),
        in_specs=[pl.BlockSpec(memory_space=pltpu.MemorySpace.VMEM)] * 11,
        out_specs=pl.BlockSpec(memory_space=pltpu.MemorySpace.VMEM),
    )(x_ld, m1, b1_t, g1_r, be1_r, m2, b2_t, g2_r, be2_r, fold, expand)
    return out_ld.reshape(B, H, W, C)


def residual_block_ref(x, w1, b1, g1, be1, w2, b2, g2, be2):
    """Pure-JAX reference (same NHWC / HWIO conventions, training-mode BN)."""
    def conv(inp, w, b):
        y = jax.lax.conv_general_dilated(
            inp, w, window_strides=(1, 1), padding="SAME",
            dimension_numbers=("NHWC", "HWIO", "NHWC"))
        return y + b.reshape(1, 1, 1, -1)

    def bn(y, g, be):
        mean = y.mean(axis=(0, 1, 2), keepdims=True)
        var = ((y - mean) ** 2).mean(axis=(0, 1, 2), keepdims=True)
        return (y - mean) / jnp.sqrt(var + EPS) * g.reshape(1, 1, 1, -1) \
            + be.reshape(1, 1, 1, -1)

    out = jax.nn.relu(bn(conv(x, w1, b1), g1, be1))
    out = bn(conv(out, w2, b2), g2, be2) + x
    return jax.nn.relu(out)


if __name__ == "__main__":
    # small shapes consistent with ResidualBlock(channels=8); W*C = 128 so the
    # lane-dense layout is exactly one full vreg row per (b, h).
    B, C, H, W = 2, 8, 16, 16

    key = jax.random.PRNGKey(0)
    ks = jax.random.split(key, 9)

    x = jax.random.normal(ks[0], (B, H, W, C), jnp.float32)
    w1 = 0.1 * jax.random.normal(ks[1], (3, 3, C, C), jnp.float32)
    b1 = 0.1 * jax.random.normal(ks[2], (1, C), jnp.float32)
    g1 = 1.0 + 0.1 * jax.random.normal(ks[3], (1, C), jnp.float32)
    be1 = 0.1 * jax.random.normal(ks[4], (1, C), jnp.float32)
    w2 = 0.1 * jax.random.normal(ks[5], (3, 3, C, C), jnp.float32)
    b2 = 0.1 * jax.random.normal(ks[6], (1, C), jnp.float32)
    g2 = 1.0 + 0.1 * jax.random.normal(ks[7], (1, C), jnp.float32)
    be2 = 0.1 * jax.random.normal(ks[8], (1, C), jnp.float32)

    y = residual_block(x, w1, b1, g1, be1, w2, b2, g2, be2)
    y = jax.block_until_ready(y)

    y_ref = residual_block_ref(x, w1, b1, g1, be1, w2, b2, g2, be2)
    max_err = float(jnp.max(jnp.abs(y - y_ref)))
    assert max_err < 2e-3, f"mismatch vs reference: {max_err}"

    print("KERNEL_OK")
</pallas_src>

<mosaic_0001>
module attributes {stable_mosaic.version = 11 : i64} {
  func.func @resblock_kernel(%arg0: memref<32x128xf32, #tpu.memory_space<vmem>>, %arg1: memref<384x128xf32, #tpu.memory_space<vmem>>, %arg2: memref<1x128xf32, #tpu.memory_space<vmem>>, %arg3: memref<1x8xf32, #tpu.memory_space<vmem>>, %arg4: memref<1x8xf32, #tpu.memory_space<vmem>>, %arg5: memref<384x128xf32, #tpu.memory_space<vmem>>, %arg6: memref<1x128xf32, #tpu.memory_space<vmem>>, %arg7: memref<1x8xf32, #tpu.memory_space<vmem>>, %arg8: memref<1x8xf32, #tpu.memory_space<vmem>>, %arg9: memref<128x8xf32, #tpu.memory_space<vmem>>, %arg10: memref<8x128xf32, #tpu.memory_space<vmem>>, %arg11: memref<32x128xf32, #tpu.memory_space<vmem>>) attributes {dimension_semantics = [], scalar_prefetch = 0 : i64, scratch_operands = 0 : i64, tpu.core_type = #tpu.core_type<tc>} {
    %c0 = arith.constant 0 : index
    %c0_0 = arith.constant 0 : index
    %0 = vector.load %arg0[%c0, %c0_0] : memref<32x128xf32, #tpu.memory_space<vmem>>, vector<32x128xf32>
    %1 = tpu.iota {dimensions = array<i32: 0>} : vector<32x1xi32>
    %c16_i32 = arith.constant 16 : i32
    %c0_i32 = arith.constant 0 : i32
    %2 = arith.cmpi eq, %c16_i32, %c0_i32 : i32
    %c1_i32 = arith.constant 1 : i32
    %3 = arith.select %2, %c1_i32, %c16_i32 : i32
    %4 = vector.broadcast %3 : i32 to vector<32x1xi32>
    %5 = arith.remsi %1, %4 : vector<32x1xi32>
    %c0_i32_1 = arith.constant 0 : i32
    %6 = vector.broadcast %c0_i32_1 : i32 to vector<32x1xi32>
    %7 = arith.cmpi ne, %5, %6 : vector<32x1xi32>
    %c0_i32_2 = arith.constant 0 : i32
    %8 = vector.broadcast %c0_i32_2 : i32 to vector<32x1xi32>
    %9 = arith.cmpi slt, %5, %8 : vector<32x1xi32>
    %c0_i32_3 = arith.constant 0 : i32
    %10 = arith.cmpi slt, %3, %c0_i32_3 : i32
    %11 = vector.broadcast %10 : i1 to vector<32x1xi1>
    %12 = vector.broadcast %11 : vector<32x1xi1> to vector<32x1xi1>
    %13 = arith.xori %9, %12 : vector<32x1xi1>
    %14 = arith.andi %13, %7 : vector<32x1xi1>
    %15 = vector.broadcast %3 : i32 to vector<32x1xi32>
    %16 = arith.addi %5, %15 : vector<32x1xi32>
    %17 = arith.select %14, %16, %5 : vector<32x1xi1>, vector<32x1xi32>
    %c0_4 = arith.constant 0 : index
    %c0_5 = arith.constant 0 : index
    %18 = vector.load %arg9[%c0_4, %c0_5] : memref<128x8xf32, #tpu.memory_space<vmem>>, vector<128x8xf32>
    %c0_6 = arith.constant 0 : index
    %c0_7 = arith.constant 0 : index
    %19 = vector.load %arg10[%c0_6, %c0_7] : memref<8x128xf32, #tpu.memory_space<vmem>>, vector<8x128xf32>
    %c0_8 = arith.constant 0 : index
    %c0_9 = arith.constant 0 : index
    %20 = vector.load %arg2[%c0_8, %c0_9] : memref<1x128xf32, #tpu.memory_space<vmem>>, vector<1x128xf32>
    %c0_10 = arith.constant 0 : index
    %c0_11 = arith.constant 0 : index
    %21 = vector.load %arg3[%c0_10, %c0_11] : memref<1x8xf32, #tpu.memory_space<vmem>>, vector<1x8xf32>
    %c0_12 = arith.constant 0 : index
    %c0_13 = arith.constant 0 : index
    %22 = vector.load %arg4[%c0_12, %c0_13] : memref<1x8xf32, #tpu.memory_space<vmem>>, vector<1x8xf32>
    %c0_i32_14 = arith.constant 0 : i32
    %23 = vector.broadcast %c0_i32_14 : i32 to vector<32x1xi32>
    %24 = arith.cmpi eq, %17, %23 : vector<32x1xi32>
    %c1_i32_15 = arith.constant 1 : i32
    %25 = tpu.dynamic_rotate %0 by %c1_i32_15 dim 0 : vector<32x128xf32>, i32 -> vector<32x128xf32>
    %cst = arith.constant 0.000000e+00 : f32
    %26 = vector.shape_cast %24 : vector<32x1xi1> to vector<32x1xi1>
    %27 = vector.broadcast %26 : vector<32x1xi1> to vector<32x128xi1>
    %28 = vector.broadcast %cst : f32 to vector<32x128xf32>
    %29 = arith.select %27, %28, %25 : vector<32x128xi1>, vector<32x128xf32>
    %c15_i32 = arith.constant 15 : i32
    %30 = vector.broadcast %c15_i32 : i32 to vector<32x1xi32>
    %31 = arith.cmpi eq, %17, %30 : vector<32x1xi32>
    %c31_i32 = arith.constant 31 : i32
    %32 = tpu.dynamic_rotate %0 by %c31_i32 dim 0 : vector<32x128xf32>, i32 -> vector<32x128xf32>
    %cst_16 = arith.constant 0.000000e+00 : f32
    %33 = vector.shape_cast %31 : vector<32x1xi1> to vector<32x1xi1>
    %34 = vector.broadcast %33 : vector<32x1xi1> to vector<32x128xi1>
    %35 = vector.broadcast %cst_16 : f32 to vector<32x128xf32>
    %36 = arith.select %34, %35, %32 : vector<32x128xi1>, vector<32x128xf32>
    %37 = tpu.concatenate %29, %0, %36 in 1 : vector<32x128xf32>, vector<32x128xf32>, vector<32x128xf32> -> vector<32x384xf32>
    %c0_17 = arith.constant 0 : index
    %c0_18 = arith.constant 0 : index
    %38 = vector.load %arg1[%c0_17, %c0_18] : memref<384x128xf32, #tpu.memory_space<vmem>>, vector<384x128xf32>
    %cst_19 = arith.constant dense<0.000000e+00> : vector<32x128xf32>
    %39 = tpu.matmul %37, %38, %cst_19 {dimension_numbers = #tpu.dot_dimension_numbers<[1], [0], [0], [1], [0, 0, 1, 1], [], []>} : vector<32x384xf32>, vector<384x128xf32>, vector<32x128xf32> -> vector<32x128xf32>
    %40 = vector.broadcast %20 : vector<1x128xf32> to vector<32x128xf32>
    %41 = arith.addf %39, %40 : vector<32x128xf32>
    %cst_20 = arith.constant dense<0.000000e+00> : vector<128xf32>
    %42 = vector.multi_reduction <add>, %41, %cst_20 [0] : vector<32x128xf32> to vector<128xf32>
    %43 = vector.shape_cast %42 : vector<128xf32> to vector<1x128xf32>
    %cst_21 = arith.constant dense<0.000000e+00> : vector<1x8xf32>
    %44 = tpu.matmul %43, %18, %cst_21 {dimension_numbers = #tpu.dot_dimension_numbers<[1], [0], [0], [1], [0, 0, 1, 1], [], []>} : vector<1x128xf32>, vector<128x8xf32>, vector<1x8xf32> -> vector<1x8xf32>
    %45 = arith.mulf %41, %41 : vector<32x128xf32>
    %cst_22 = arith.constant dense<0.000000e+00> : vector<128xf32>
    %46 = vector.multi_reduction <add>, %45, %cst_22 [0] : vector<32x128xf32> to vector<128xf32>
    %47 = vector.shape_cast %46 : vector<128xf32> to vector<1x128xf32>
    %cst_23 = arith.constant dense<0.000000e+00> : vector<1x8xf32>
    %48 = tpu.matmul %47, %18, %cst_23 {dimension_numbers = #tpu.dot_dimension_numbers<[1], [0], [0], [1], [0, 0, 1, 1], [], []>} : vector<1x128xf32>, vector<128x8xf32>, vector<1x8xf32> -> vector<1x8xf32>
    %cst_24 = arith.constant 0.001953125 : f32
    %49 = vector.broadcast %cst_24 : f32 to vector<1x8xf32>
    %50 = arith.mulf %44, %49 : vector<1x8xf32>
    %cst_25 = arith.constant 0.001953125 : f32
    %51 = vector.broadcast %cst_25 : f32 to vector<1x8xf32>
    %52 = arith.mulf %48, %51 : vector<1x8xf32>
    %53 = arith.mulf %50, %50 : vector<1x8xf32>
    %54 = arith.subf %52, %53 : vector<1x8xf32>
    %cst_26 = arith.constant 9.99999974E-6 : f32
    %55 = vector.broadcast %cst_26 : f32 to vector<1x8xf32>
    %56 = arith.addf %54, %55 : vector<1x8xf32>
    %57 = math.rsqrt %56 : vector<1x8xf32>
    %58 = arith.mulf %21, %57 : vector<1x8xf32>
    %59 = arith.mulf %50, %58 : vector<1x8xf32>
    %60 = arith.subf %22, %59 : vector<1x8xf32>
    %cst_27 = arith.constant dense<0.000000e+00> : vector<1x128xf32>
    %61 = tpu.matmul %58, %19, %cst_27 {dimension_numbers = #tpu.dot_dimension_numbers<[1], [0], [0], [1], [0, 0, 1, 1], [], []>} : vector<1x8xf32>, vector<8x128xf32>, vector<1x128xf32> -> vector<1x128xf32>
    %cst_28 = arith.constant dense<0.000000e+00> : vector<1x128xf32>
    %62 = tpu.matmul %60, %19, %cst_28 {dimension_numbers = #tpu.dot_dimension_numbers<[1], [0], [0], [1], [0, 0, 1, 1], [], []>} : vector<1x8xf32>, vector<8x128xf32>, vector<1x128xf32> -> vector<1x128xf32>
    %63 = vector.broadcast %61 : vector<1x128xf32> to vector<32x128xf32>
    %64 = arith.mulf %41, %63 : vector<32x128xf32>
    %65 = vector.broadcast %62 : vector<1x128xf32> to vector<32x128xf32>
    %66 = arith.addf %64, %65 : vector<32x128xf32>
    %cst_29 = arith.constant 0.000000e+00 : f32
    %67 = vector.broadcast %cst_29 : f32 to vector<32x128xf32>
    %68 = arith.maximumf %66, %67 : vector<32x128xf32>
    %c0_30 = arith.constant 0 : index
    %c0_31 = arith.constant 0 : index
    %69 = vector.load %arg6[%c0_30, %c0_31] : memref<1x128xf32, #tpu.memory_space<vmem>>, vector<1x128xf32>
    %c0_32 = arith.constant 0 : index
    %c0_33 = arith.constant 0 : index
    %70 = vector.load %arg7[%c0_32, %c0_33] : memref<1x8xf32, #tpu.memory_space<vmem>>, vector<1x8xf32>
    %c0_34 = arith.constant 0 : index
    %c0_35 = arith.constant 0 : index
    %71 = vector.load %arg8[%c0_34, %c0_35] : memref<1x8xf32, #tpu.memory_space<vmem>>, vector<1x8xf32>
    %c0_i32_36 = arith.constant 0 : i32
    %72 = vector.broadcast %c0_i32_36 : i32 to vector<32x1xi32>
    %73 = arith.cmpi eq, %17, %72 : vector<32x1xi32>
    %c1_i32_37 = arith.constant 1 : i32
    %74 = tpu.dynamic_rotate %68 by %c1_i32_37 dim 0 : vector<32x128xf32>, i32 -> vector<32x128xf32>
    %cst_38 = arith.constant 0.000000e+00 : f32
    %75 = vector.shape_cast %73 : vector<32x1xi1> to vector<32x1xi1>
    %76 = vector.broadcast %75 : vector<32x1xi1> to vector<32x128xi1>
    %77 = vector.broadcast %cst_38 : f32 to vector<32x128xf32>
    %78 = arith.select %76, %77, %74 : vector<32x128xi1>, vector<32x128xf32>
    %c15_i32_39 = arith.constant 15 : i32
    %79 = vector.broadcast %c15_i32_39 : i32 to vector<32x1xi32>
    %80 = arith.cmpi eq, %17, %79 : vector<32x1xi32>
    %c31_i32_40 = arith.constant 31 : i32
    %81 = tpu.dynamic_rotate %68 by %c31_i32_40 dim 0 : vector<32x128xf32>, i32 -> vector<32x128xf32>
    %cst_41 = arith.constant 0.000000e+00 : f32
    %82 = vector.shape_cast %80 : vector<32x1xi1> to vector<32x1xi1>
    %83 = vector.broadcast %82 : vector<32x1xi1> to vector<32x128xi1>
    %84 = vector.broadcast %cst_41 : f32 to vector<32x128xf32>
    %85 = arith.select %83, %84, %81 : vector<32x128xi1>, vector<32x128xf32>
    %86 = tpu.concatenate %78, %68, %85 in 1 : vector<32x128xf32>, vector<32x128xf32>, vector<32x128xf32> -> vector<32x384xf32>
    %c0_42 = arith.constant 0 : index
    %c0_43 = arith.constant 0 : index
    %87 = vector.load %arg5[%c0_42, %c0_43] : memref<384x128xf32, #tpu.memory_space<vmem>>, vector<384x128xf32>
    %cst_44 = arith.constant dense<0.000000e+00> : vector<32x128xf32>
    %88 = tpu.matmul %86, %87, %cst_44 {dimension_numbers = #tpu.dot_dimension_numbers<[1], [0], [0], [1], [0, 0, 1, 1], [], []>} : vector<32x384xf32>, vector<384x128xf32>, vector<32x128xf32> -> vector<32x128xf32>
    %89 = vector.broadcast %69 : vector<1x128xf32> to vector<32x128xf32>
    %90 = arith.addf %88, %89 : vector<32x128xf32>
    %cst_45 = arith.constant dense<0.000000e+00> : vector<128xf32>
    %91 = vector.multi_reduction <add>, %90, %cst_45 [0] : vector<32x128xf32> to vector<128xf32>
    %92 = vector.shape_cast %91 : vector<128xf32> to vector<1x128xf32>
    %cst_46 = arith.constant dense<0.000000e+00> : vector<1x8xf32>
    %93 = tpu.matmul %92, %18, %cst_46 {dimension_numbers = #tpu.dot_dimension_numbers<[1], [0], [0], [1], [0, 0, 1, 1], [], []>} : vector<1x128xf32>, vector<128x8xf32>, vector<1x8xf32> -> vector<1x8xf32>
    %94 = arith.mulf %90, %90 : vector<32x128xf32>
    %cst_47 = arith.constant dense<0.000000e+00> : vector<128xf32>
    %95 = vector.multi_reduction <add>, %94, %cst_47 [0] : vector<32x128xf32> to vector<128xf32>
    %96 = vector.shape_cast %95 : vector<128xf32> to vector<1x128xf32>
    %cst_48 = arith.constant dense<0.000000e+00> : vector<1x8xf32>
    %97 = tpu.matmul %96, %18, %cst_48 {dimension_numbers = #tpu.dot_dimension_numbers<[1], [0], [0], [1], [0, 0, 1, 1], [], []>} : vector<1x128xf32>, vector<128x8xf32>, vector<1x8xf32> -> vector<1x8xf32>
    %cst_49 = arith.constant 0.001953125 : f32
    %98 = vector.broadcast %cst_49 : f32 to vector<1x8xf32>
    %99 = arith.mulf %93, %98 : vector<1x8xf32>
    %cst_50 = arith.constant 0.001953125 : f32
    %100 = vector.broadcast %cst_50 : f32 to vector<1x8xf32>
    %101 = arith.mulf %97, %100 : vector<1x8xf32>
    %102 = arith.mulf %99, %99 : vector<1x8xf32>
    %103 = arith.subf %101, %102 : vector<1x8xf32>
    %cst_51 = arith.constant 9.99999974E-6 : f32
    %104 = vector.broadcast %cst_51 : f32 to vector<1x8xf32>
    %105 = arith.addf %103, %104 : vector<1x8xf32>
    %106 = math.rsqrt %105 : vector<1x8xf32>
    %107 = arith.mulf %70, %106 : vector<1x8xf32>
    %108 = arith.mulf %99, %107 : vector<1x8xf32>
    %109 = arith.subf %71, %108 : vector<1x8xf32>
    %cst_52 = arith.constant dense<0.000000e+00> : vector<1x128xf32>
    %110 = tpu.matmul %107, %19, %cst_52 {dimension_numbers = #tpu.dot_dimension_numbers<[1], [0], [0], [1], [0, 0, 1, 1], [], []>} : vector<1x8xf32>, vector<8x128xf32>, vector<1x128xf32> -> vector<1x128xf32>
    %cst_53 = arith.constant dense<0.000000e+00> : vector<1x128xf32>
    %111 = tpu.matmul %109, %19, %cst_53 {dimension_numbers = #tpu.dot_dimension_numbers<[1], [0], [0], [1], [0, 0, 1, 1], [], []>} : vector<1x8xf32>, vector<8x128xf32>, vector<1x128xf32> -> vector<1x128xf32>
    %112 = vector.broadcast %110 : vector<1x128xf32> to vector<32x128xf32>
    %113 = arith.mulf %90, %112 : vector<32x128xf32>
    %114 = vector.broadcast %111 : vector<1x128xf32> to vector<32x128xf32>
    %115 = arith.addf %113, %114 : vector<32x128xf32>
    %116 = arith.addf %115, %0 : vector<32x128xf32>
    %cst_54 = arith.constant 0.000000e+00 : f32
    %117 = vector.broadcast %cst_54 : f32 to vector<32x128xf32>
    %118 = arith.maximumf %116, %117 : vector<32x128xf32>
    %c0_55 = arith.constant 0 : index
    %c0_56 = arith.constant 0 : index
    %119 = vector.load %arg11[%c0_55, %c0_56] : memref<32x128xf32, #tpu.memory_space<vmem>>, vector<32x128xf32>
    tpu.vector_store %arg11[%c0_55, %c0_56], %118 {strides = array<i32>} : memref<32x128xf32, #tpu.memory_space<vmem>>, vector<32x128xf32>,
    return
  }
}

</mosaic_0001>

<bundles_post_ra>
// kernel: tpu_custom_call.1
= control target key start
LH: loop header
LB: loop body
LE: loop exit
PB: predicated region body
PF: predicated region fallthrough
CT: control target
= control target key end

     0   :  { %16 = vsyncpa [#allocation3], 0  ;;  %s2585_s0 = inlined_call_operand.vmem [shape: f32[32,128], index: 0, kind: input, shape index: {}]   ;;  %s2586_s1 = inlined_call_operand.hbm [shape: f32[384,128], index: 1, kind: input, shape index: {}]   ;;  %s2587_s2 = inlined_call_operand.vmem [shape: f32[1,128], index: 2, kind: input, shape index: {}]   ;;  %s2588_s3 = inlined_call_operand.vmem [shape: f32[1,8], index: 3, kind: input, shape index: {}]   ;;  %s2589_s4 = inlined_call_operand.vmem [shape: f32[1,8], index: 4, kind: input, shape index: {}]   ;;  %s2590_s5 = inlined_call_operand.hbm [shape: f32[384,128], index: 5, kind: input, shape index: {}]   ;;  %s2591_s6 = inlined_call_operand.vmem [shape: f32[1,128], index: 6, kind: input, shape index: {}]   ;;  %s2592_s7 = inlined_call_operand.vmem [shape: f32[1,8], index: 7, kind: input, shape index: {}]   ;;  %s2593_s8 = inlined_call_operand.vmem [shape: f32[1,8], index: 8, kind: input, shape index: {}]   ;;  %s2594_s9 = inlined_call_operand.vmem [shape: f32[128,8], index: 9, kind: input, shape index: {}]   ;;  %s2595_s10 = inlined_call_operand.vmem [shape: f32[8,128], index: 10, kind: input, shape index: {}]   ;;  %s2596_s11 = inlined_call_operand.hbm [shape: f32[32,128], index: 11, kind: output, shape index: {}]  }
   0x1   :  { %17 = vsyncpa [#allocation6], 0 }
   0x2   :  { %18 = vsyncpa [#allocation4], 0  ;;  %s2144_s17 = smov [#allocation2]   ;;  %s2072_s21 = scalar_lea.hbm %s2586_s1, 6144 }
   0x3   :  { %s26_s18 = sshll.u32 %s2144_s17, 4  ;;  %p2073_p0 = scmp.ne.s32.totalorder %s2586_s1, %s2072_s21  ;;  %s27_s18 = int_to_ptr.vmem [resolvable:$true] %s26_s18 }
   0x4   :  { %p2076_p1 = scmp.lt.u32.totalorder %s2072_s21, %s2586_s1 }
   0x6   :  { %p2078_p2 = pnand %p2076_p1, %p2073_p0 }
   0x8   :  { %2081 = shalt.err (!%p2078_p2)
}
   0x9   :  { %s2082_s26 = scalar_lea.vmem %s27_s18, 6144  ;;  %p2087_p4 = scmp.lt.s32.totalorder %s27_s18, %s27_s18 }
   0xa   :  { %p2083_p3 = scmp.ne.s32.totalorder %s27_s18, %s2082_s26  ;;  %p2088_p5 = scmp.lt.s32.totalorder %s2082_s26, %s2082_s26 }
   0xc   :  { %p2089_p6 = por %p2088_p5, %p2087_p4 }
   0xe   :  { %p2090_p7 = pnand %p2089_p6, %p2083_p3 }
  0x10   :  { %2093 = shalt.err (!%p2090_p7)
}
  0x11   :  { %s2145_s27 = smov 128   ;;  %s2146_s28 = smov 8  }
  0x12   :  { %32 = dma.hbm_to_vmem [thread:$0]  %s2586_s1, 6144, %s27_s18, [#allocation3], %s2145_s27, %s2145_s27, %s2146_s28  }
  0x13   :  { %s2147_s12 = smov [#allocation5]   ;;  %s2094_s16 = scalar_lea.hbm %s2590_s5, 6144 }
  0x14   :  { %s44_s13 = sshll.u32 %s2147_s12, 4  ;;  %p2095_p8 = scmp.ne.s32.totalorder %s2590_s5, %s2094_s16  ;;  %s45_s13 = int_to_ptr.vmem [resolvable:$true] %s44_s13 }
  0x15   :  { %p2098_p9 = scmp.lt.u32.totalorder %s2094_s16, %s2590_s5 }
  0x17   :  { %p2100_p10 = pnand %p2098_p9, %p2095_p8 }
  0x19   :  { %2103 = shalt.err (!%p2100_p10)
}
  0x1a   :  { %s2104_s22 = scalar_lea.vmem %s45_s13, 6144  ;;  %p2109_p12 = scmp.lt.s32.totalorder %s45_s13, %s45_s13 }
  0x1b   :  { %p2105_p11 = scmp.ne.s32.totalorder %s45_s13, %s2104_s22  ;;  %p2110_p13 = scmp.lt.s32.totalorder %s2104_s22, %s2104_s22 }
  0x1d   :  { %p2111_p0 = por %p2110_p13, %p2109_p12 }
  0x1f   :  { %p2112_p1 = pnand %p2111_p0, %p2105_p11 }
  0x21   :  { %2115 = shalt.err (!%p2112_p1)
}
  0x22   :  { %50 = dma.hbm_to_vmem [thread:$0]  %s2590_s5, 6144, %s45_s13, [#allocation6], %s2145_s27, %s2145_s27, %s2146_s28  }
  0x23   :  { %2138 = dma.done.wait [#allocation3], 6144  }
  0x24   :  { %2139 = vsyncadd [#allocation3], 4294961152 }
  0x25   :  { %2140 = dma.done.wait [#allocation6], 6144  }
  0x26   :  { %2141 = vsyncadd [#allocation6], 4294961152  ;;  %v210_v0 = vld [vmem:[#allocation2 + $0x80] sm:$0xff]  ;;  %v211_v1 = vld [vmem:[#allocation2 + $0x88] sm:$0xff]  ;;  %v71_v36 = vlaneseq  ;;  %vm2149_vm6 = vmmov 0   ;;  %vm589_vm7 = vcmask 64512  }
  0x27   :  { %v194_v2 = vld [vmem:[#allocation2] sm:$0xff]  ;;  %v1836_v3 = vpack.c.bf16 %v211_v1, %v210_v0  ;;  %v195_v4 = vld [vmem:[#allocation2 + $0x8] sm:$0xff]  ;;  %v212_v5 = vld [vmem:[#allocation2 + $0x90] sm:$0xff] }
  0x28   :  { %v213_v6 = vld [vmem:[#allocation2 + $0x98] sm:$0xff]  ;;  %v1838_v7 = vpack.c.bf16 %v195_v4, %v194_v2  ;;  %v226_v9 = vld [vmem:[#allocation2 + $0x100] sm:$0xff]  ;;  %v227_v10 = vld [vmem:[#allocation2 + $0x108] sm:$0xff]  ;;  %v2242_v46 = vshrl.u32 %v71_v36, 7 }
  0x29   :  { %v1840_v8 = vpack.c.bf16 %v213_v6, %v212_v5  ;;  %v196_v11 = vld [vmem:[#allocation2 + $0x10] sm:$0xff]  ;;  %1837 = vmatprep.subr.bf16.mxu0 %v1836_v3  ;;  %v1868_v12 = vpack.c.bf16 %v227_v10, %v226_v9  ;;  %v197_v13 = vld [vmem:[#allocation2 + $0x18] sm:$0xff]  ;;  %v214_v14 = vld [vmem:[#allocation2 + $0xa0] sm:$0xff] }
  0x2a   :  { %v215_v15 = vld [vmem:[#allocation2 + $0xa8] sm:$0xff]  ;;  %1839 = vmatpush3.bf16.msra.mxu0 %v1838_v7  ;;  %v1842_v16 = vpack.c.bf16 %v197_v13, %v196_v11  ;;  %v228_v17 = vld [vmem:[#allocation2 + $0x110] sm:$0xff]  ;;  %v229_v18 = vld [vmem:[#allocation2 + $0x118] sm:$0xff]  ;;  %vm177_vm0 = vcmp.lt.s32.totalorder %v2242_v46, 7  ;;  %vm152_vm1 = vcmp.lt.s32.totalorder %v2242_v46, 1 }
  0x2b   :  { %1841 = vmatprep.subr.bf16.mxu0 %v1840_v8  ;;  %1869 = vmatprep.subr.bf16.mxu1 %v1868_v12  ;;  %v1844_v19 = vpack.c.bf16 %v215_v15, %v214_v14  ;;  %v1872_v20 = vpack.c.bf16 %v229_v18, %v228_v17  ;;  %v198_v21 = vld [vmem:[#allocation2 + $0x20] sm:$0xff]  ;;  %v199_v22 = vld [vmem:[#allocation2 + $0x28] sm:$0xff]  ;;  %v216_v23 = vld [vmem:[#allocation2 + $0xb0] sm:$0xff]  ;;  %v73_v14 = vadd.s32 8, %v2242_v46 }
  0x2c   :  { %1871 = vmatpush3.bf16.msra.mxu1 %v1868_v12  ;;  %v217_v24 = vld [vmem:[#allocation2 + $0xb8] sm:$0xff]  ;;  %v230_v25 = vld [vmem:[#allocation2 + $0x120] sm:$0xff]  ;;  %v231_v26 = vld [vmem:[#allocation2 + $0x128] sm:$0xff]  ;;  %v1846_v28 = vpack.c.bf16 %v199_v22, %v198_v21 }
  0x2d   :  { %1873 = vmatprep.subr.bf16.mxu1 %v1872_v20  ;;  %v1876_v27 = vpack.c.bf16 %v231_v26, %v230_v25  ;;  %v232_v29 = vld [vmem:[#allocation2 + $0x130] sm:$0xff]  ;;  %v233_v30 = vld [vmem:[#allocation2 + $0x138] sm:$0xff]  ;;  %v1848_v31 = vpack.c.bf16 %v217_v24, %v216_v23  ;;  %v218_v34 = vld [vmem:[#allocation2 + $0xc0] sm:$0xff]  ;;  %v87_v21 = vand.u32 15, %v73_v14  ;;  %v75_v23 = vadd.s32 24, %v2242_v46 }
  0x2e   :  { %1843 = vmatpush3.bf16.msra.mxu0 %v1842_v16  ;;  %v200_v32 = vld [vmem:[#allocation2 + $0x30] sm:$0xff]  ;;  %v201_v33 = vld [vmem:[#allocation2 + $0x38] sm:$0xff]  ;;  %v219_v35 = vld [vmem:[#allocation2 + $0xc8] sm:$0xff]  ;;  %v1880_v37 = vpack.c.bf16 %v233_v30, %v232_v29 }
  0x2f   :  { %1845 = vmatprep.subr.bf16.mxu0 %v1844_v19  ;;  %v1850_v38 = vpack.c.bf16 %v201_v33, %v200_v32  ;;  %v234_v39 = vld [vmem:[#allocation2 + $0x140] sm:$0xff]  ;;  %v235_v40 = vld [vmem:[#allocation2 + $0x148] sm:$0xff]  ;;  %v1852_v41 = vpack.c.bf16 %v219_v35, %v218_v34  ;;  %v220_v44 = vld [vmem:[#allocation2 + $0xd0] sm:$0xff]  ;;  %v80_v19 = vand.u32 15, %v2242_v46  ;;  %vm2290_vm3 = vcmp.ne.s32.totalorder %v87_v21, 15 }
  0x30   :  { %1875 = vmatpush3.bf16.msra.mxu1 %v1872_v20  ;;  %v202_v42 = vld [vmem:[#allocation2 + $0x40] sm:$0xff]  ;;  %v203_v43 = vld [vmem:[#allocation2 + $0x48] sm:$0xff]  ;;  %v221_v45 = vld [vmem:[#allocation2 + $0xd8] sm:$0xff]  ;;  %v1884_v47 = vpack.c.bf16 %v235_v40, %v234_v39 }
  0x31   :  { %1877 = vmatprep.subr.bf16.mxu1 %v1876_v27  ;;  %v2247_v48 = vld [vmem:[%s2585_s0] sm:$0xff]  ;;  %v1854_v49 = vpack.c.bf16 %v203_v43, %v202_v42  ;;  %v236_v50 = vld [vmem:[#allocation2 + $0x150] sm:$0xff]  ;;  %v237_v51 = vld [vmem:[#allocation2 + $0x158] sm:$0xff]  ;;  %v1856_v54 = vpack.c.bf16 %v221_v45, %v220_v44  ;;  %vm2282_vm2 = vcmp.ne.s32.totalorder %v80_v19, 0  ;;  %v2148_v44 = vmov 0.0|0.0  }
  0x32   :  { %1847 = vmatpush3.bf16.msra.mxu0 %v1846_v28  ;;  %312 = vmatprep.mubr.f32.mxu0 %v2247_v48  ;;  %v2253_v52 = vld [vmem:[%s2585_s0 + $0x8] sm:$0xff]  ;;  %v173_v53 = vrot.slane %v2247_v48, 1  ;;  %v204_v55 = vld [vmem:[#allocation2 + $0x50] sm:$0xff]  ;;  %v205_v56 = vld [vmem:[#allocation2 + $0x58] sm:$0xff]  ;;  %v1888_v60 = vpack.c.bf16 %v237_v51, %v236_v50  ;;  %v148_v18 = vrot.slane %v2247_v48, 7  ;;  %v74_v28 = vadd.s32 16, %v2242_v46 }
  0x33   :  { %1849 = vmatprep.subr.bf16.mxu0 %v1848_v31  ;;  %v174_v57 = vrot.slane %v2253_v52, 1  ;;  %v222_v58 = vld [vmem:[#allocation2 + $0xe0] sm:$0xff]  ;;  %v223_v59 = vld [vmem:[#allocation2 + $0xe8] sm:$0xff]  ;;  %v1858_v62 = vpack.c.bf16 %v205_v56, %v204_v55  ;;  %v224_v4 = vld [vmem:[#allocation2 + $0xf0] sm:$0xff]  ;;  %v101_v31 = vand.u32 15, %v75_v23 }
  0x34   :  { %1879 = vmatpush3.bf16.msra.mxu1 %v1876_v27  ;;  %v238_v63 = vld [vmem:[#allocation2 + $0x160] sm:$0xff]  ;;  %v239_v0 = vld [vmem:[#allocation2 + $0x168] sm:$0xff]  ;;  %v1860_v1 = vpack.c.bf16 %v223_v59, %v222_v58  ;;  %v225_v5 = vld [vmem:[#allocation2 + $0xf8] sm:$0xff]  ;;  %v149_v27 = vrot.slane %v2253_v52, 7  ;;  %v94_v34 = vand.u32 15, %v74_v28 }
  0x35   :  { %1881 = vmatprep.subr.bf16.mxu1 %v1880_v37  ;;  %v180_v61 = vsel %vm177_vm0, %v173_v53, %v174_v57  ;;  %v206_v2 = vld [vmem:[#allocation2 + $0x60] sm:$0xff]  ;;  %v207_v3 = vld [vmem:[#allocation2 + $0x68] sm:$0xff]  ;;  %v1892_v6 = vpack.c.bf16 %v239_v0, %v238_v63  ;;  %v240_v8 = vld [vmem:[#allocation2 + $0x170] sm:$0xff]  ;;  %v1864_v10 = vpack.c.bf16 %v225_v5, %v224_v4  ;;  %vm2308_vm4 = vcmp.ne.s32.totalorder %v101_v31, 15 }
  0x36   :  { %1851 = vmatpush3.bf16.msra.mxu0 %v1850_v38  ;;  %1632 = vmatprep.mubr.f32.mxu1 %v180_v61  ;;  %v1862_v7 = vpack.c.bf16 %v207_v3, %v206_v2  ;;  %v241_v9 = vld [vmem:[#allocation2 + $0x178] sm:$0xff]  ;;  %v208_v11 = vld [vmem:[#allocation2 + $0x70] sm:$0xff]  ;;  %v155_v33 = vsel %vm152_vm1, %v148_v18, %v149_v27  ;;  %vm2315_vm5 = vcmp.ne.s32.totalorder %v94_v34, 0  ;;  %v125_v42 = vld [vmem:[%s2594_s9 + $0x8] sm:$0xff]  ;;  %v2150_v5 = vmov 0.0  }
  0x37   :  { %1853 = vmatprep.subr.bf16.mxu0 %v1852_v41  ;;  %v209_v12 = vld [vmem:[#allocation2 + $0x78] sm:$0xff]  ;;  %v1896_v15 = vpack.c.bf16 %v241_v9, %v240_v8  ;;  %v2271_v16 = vld [vmem:[%s2585_s0 + $0x10] sm:$0xff]  ;;  %v124_v41 = vld [vmem:[%s2594_s9] sm:$0xff] }
  0x38   :  { %1883 = vmatpush3.bf16.msra.mxu1 %v1880_v37  ;;  %v2265_v13 = vld [vmem:[%s2585_s0 + $0x18] sm:$0xff]  ;;  %v1866_v17 = vpack.c.bf16 %v209_v12, %v208_v11  ;;  %v175_v22 = vrot.slane %v2271_v16, 1  ;;  %v150_v35 = vrot.slane %v2271_v16, 7  ;;  %v2332_v43 = vpack.c.bf16 %v125_v42, %v124_v41  ;;  %v126_v45 = vld [vmem:[%s2594_s9 + $0x10] sm:$0xff]  ;;  %v128_v50 = vld [vmem:[%s2594_s9 + $0x20] sm:$0xff] }
  0x39   :  { %1885 = vmatprep.subr.bf16.mxu1 %v1884_v47  ;;  %v151_v20 = vrot.slane %v2265_v13, 7  ;;  %v176_v24 = vrot.slane %v2265_v13, 1  ;;  %v129_v51 = vld [vmem:[%s2594_s9 + $0x28] sm:$0xff]  ;;  %v131_v55 = vld [vmem:[%s2594_s9 + $0x38] sm:$0xff]  ;;  %v136_v63 = vld [vmem:[%s2594_s9 + $0x60] sm:$0xff] }
  0x3a   :  { %1855 = vmatpush3.bf16.msra.mxu0 %v1854_v49  ;;  %v179_v29 = vsel %vm177_vm0, %v174_v57, %v175_v22  ;;  %v154_v38 = vsel %vm152_vm1, %v149_v27, %v150_v35  ;;  %v132_v57 = vld [vmem:[%s2594_s9 + $0x40] sm:$0xff]  ;;  %v133_v58 = vld [vmem:[%s2594_s9 + $0x48] sm:$0xff]  ;;  %v135_v61 = vld [vmem:[%s2594_s9 + $0x58] sm:$0xff] }
  0x3b   :  { %1857 = vmatprep.subr.bf16.mxu0 %v1856_v54  ;;  %v156_v25 = vsel %vm152_vm1, %v151_v20, %v148_v18  ;;  %v178_v32 = vsel %vm177_vm0, %v175_v22, %v176_v24  ;;  %v181_v36 = vsel %vm177_vm0, %v176_v24, %v173_v53  ;;  %v153_v40 = vsel %vm152_vm1, %v150_v35, %v151_v20  ;;  %v130_v54 = vld [vmem:[%s2594_s9 + $0x30] sm:$0xff]  ;;  %v137_v0 = vld [vmem:[%s2594_s9 + $0x68] sm:$0xff]  ;;  %v139_v3 = vld [vmem:[%s2594_s9 + $0x78] sm:$0xff] }
  0x3c   :  { %1887 = vmatpush3.bf16.msra.mxu1 %v1884_v47  ;;  %v127_v47 = vld [vmem:[%s2594_s9 + $0x18] sm:$0xff]  ;;  %v2358_v53 = vpack.c.bf16 %v129_v51, %v128_v50  ;;  %v2370_v56 = vpack.c.bf16 %v131_v55, %v130_v54  ;;  %v2382_v59 = vpack.c.bf16 %v133_v58, %v132_v57  ;;  %v138_v2 = vld [vmem:[%s2594_s9 + $0x70] sm:$0xff]  ;;  %v1370_v8 = vld [vmem:[%s2587_s2] ss:$0 sm:$0xff] }
  0x3d   :  { %1889 = vmatprep.subr.bf16.mxu1 %v1888_v60  ;;  %v2346_v49 = vpack.c.bf16 %v127_v47, %v126_v45  ;;  %v2418_v4 = vpack.c.bf16 %v139_v3, %v138_v2  ;;  %v1381_v39 = vld [vmem:[%s2591_s6] ss:$0 sm:$0xff] }
  0x3e   :  { %1859 = vmatpush3.bf16.msra.mxu0 %v1858_v62 }
  0x3f   :  { %1861 = vmatprep.subr.bf16.mxu0 %v1860_v1  ;;  %v2406_v1 = vpack.c.bf16 %v137_v0, %v136_v63 }
  0x40   :  { %1891 = vmatpush3.bf16.msra.mxu1 %v1888_v60  ;;  %v134_v60 = vld [vmem:[%s2594_s9 + $0x50] sm:$0xff] }
  0x41   :  { %1893 = vmatprep.subr.bf16.mxu1 %v1892_v6  ;;  %v2394_v62 = vpack.c.bf16 %v135_v61, %v134_v60 }
  0x42   :  { %1863 = vmatpush3.bf16.msra.mxu0 %v1862_v7 }
  0x43   :  { %1865 = vmatprep.subr.bf16.mxu0 %v1864_v10 }
  0x44   :  { %1895 = vmatpush3.bf16.msra.mxu1 %v1892_v6 }
  0x45   :  { %1897 = vmatprep.subr.bf16.mxu1 %v1896_v15 }
  0x46   :  { %1867 = vmatpush3.bf16.msra.mxu0 %v1866_v17 }
  0x47   :  { %1900 = vmatprep.subr.bf16.mxu0 %v2148_v44 }
  0x48   :  { %1899 = vmatpush3.bf16.msra.mxu1 %v1896_v15 }
  0x49   :  { %1372 = vmatmul.mubr.msk.f32.vlgmr.msra.gmra.mrb[0].mxu0 %vm2282_vm2, %v156_v25  ;;  %1924 = vmatprep.subr.bf16.mxu1 %v2148_v44 }
  0x4a   :  { %317 = vmatprep.mubr.f32.mxu0 %v2253_v52  ;;  %1902 = vmatpush3.bf16.msra.mxu0 %v2332_v43 }
  0x4b   :  { %1633 = vmatmul.mubr.msk.f32.vlgmr.msra.gmra.mrb[0].mxu1 %vm2290_vm3, %v179_v29  ;;  %1903 = vmatprep.subr.bf16.mxu0 %v2148_v44 }
  0x4c   :  { %1635 = vmatprep.mubr.f32.mxu1 %v178_v32  ;;  %1926 = vmatpush3.bf16.msra.mxu1 %v2332_v43 }
  0x4d   :  { %318 = vmatmul.mubr.f32.gmra.mrb[2].mxu0 %v155_v33  ;;  %1927 = vmatprep.subr.bf16.mxu1 %v2148_v44 }
  0x4e   :  { %322 = vmatprep.mubr.f32.mxu0 %v2271_v16  ;;  %1905 = vmatpush3.bf16.msra.mxu0 %v2346_v49 }
  0x4f   :  { %1636 = vmatmul.mubr.msk.f32.gmra.mrb[2].mxu1 %vm2308_vm4, %v181_v36  ;;  %1906 = vmatprep.subr.bf16.mxu0 %v2148_v44 }
  0x50   :  { %1929 = vmatpush3.bf16.msra.mxu1 %v2346_v49  ;;  %1705 = vmatprep.mubr.msk.f32.mxu1 %vm2149_vm6, %v2150_v5 }
  0x51   :  { %1374 = vmatmul.mubr.msk.f32.gmra.mrb[4].mxu0 %vm2315_vm5, %v154_v38  ;;  %1930 = vmatprep.subr.bf16.mxu1 %v2148_v44 }
  0x52   :  { %327 = vmatprep.mubr.f32.mxu0 %v2265_v13  ;;  %1908 = vmatpush3.bf16.msra.mxu0 %v2358_v53 }
  0x53   :  { %1909 = vmatprep.subr.bf16.mxu0 %v2148_v44 }
  0x54   :  { %1932 = vmatpush3.bf16.msra.mxu1 %v2358_v53 }
  0x55   :  { %328 = vmatmul.mubr.f32.gmra.mrb[6].mxu0 %v153_v40  ;;  %1933 = vmatprep.subr.bf16.mxu1 %v2148_v44 }
  0x56   :  { %1911 = vmatpush3.bf16.msra.mxu0 %v2370_v56  ;;  %1670 = vmatprep.mubr.msk.f32.mxu0 %vm2149_vm6, %v2150_v5 }
  0x57   :  { %1912 = vmatprep.subr.bf16.mxu0 %v2148_v44 }
  0x58   :  { %1935 = vmatpush3.bf16.msra.mxu1 %v2370_v56 }
  0x59   :  { %1936 = vmatprep.subr.bf16.mxu1 %v2148_v44 }
  0x5a   :  { %1914 = vmatpush3.bf16.msra.mxu0 %v2382_v59 }
  0x5b   :  { %1915 = vmatprep.subr.bf16.mxu0 %v2148_v44 }
  0x5c   :  { %1938 = vmatpush3.bf16.msra.mxu1 %v2382_v59 }
  0x5d   :  { %1939 = vmatprep.subr.bf16.mxu1 %v2148_v44 }
  0x5e   :  { %1917 = vmatpush3.bf16.msra.mxu0 %v2394_v62 }
  0x5f   :  { %1918 = vmatprep.subr.bf16.mxu0 %v2148_v44 }
  0x60   :  { %1941 = vmatpush3.bf16.msra.mxu1 %v2394_v62 }
  0x61   :  { %1942 = vmatprep.subr.bf16.mxu1 %v2148_v44 }
  0x62   :  { %1920 = vmatpush3.bf16.msra.mxu0 %v2406_v1 }
  0x63   :  { %1921 = vmatprep.subr.bf16.mxu0 %v2148_v44 }
  0x64   :  { %1944 = vmatpush3.bf16.msra.mxu1 %v2406_v1 }
  0x65   :  { %1945 = vmatprep.subr.bf16.mxu1 %v2148_v44 }
  0x66   :  { %1923 = vmatpush3.bf16.msra.mxu0 %v2418_v4 }
  0x67   :  { %1708 = vmatprep.subr.mxu0 %v2150_v5 }
  0x68   :  { %1947 = vmatpush3.bf16.msra.mxu1 %v2418_v4 }
  0x69   :  { %1713 = vmatprep.subr.mxu1 %v2150_v5 }
 0x11c   :  { %v1428_v6 = vpop.f32.mrb[0].mxu0 }
 0x11d   :  { %v1429_v7 = vpop.f32.mrb[1].mxu0 }
 0x11e   :  { %v1430_v9 = vadd.f32 %v1429_v7, %v1428_v6  ;;  %v1634_v10 = vpop.f32.mrb[0].mxu1 }
 0x11f   :  { %v399_v11 = vpop.f32.mrb[1].mxu1 }
 0x120   :  { %v1431_v12 = vpop.f32.mrb[2].mxu0  ;;  %v315_v14 = vadd.f32 %v1430_v9, %v1370_v8  ;;  %v799_v9 = vld [vmem:[#allocation5 + $0x80] sm:$0xff] }
 0x121   :  { %v1432_v15 = vpop.f32.mrb[3].mxu0 }
 0x122   :  { %v1433_v17 = vadd.f32 %v1432_v15, %v1431_v12  ;;  %v2431_v18 = vadd.f32 %v399_v11, %v315_v14  ;;  %v1637_v19 = vpop.f32.mrb[2].mxu1  ;;  %v815_v12 = vld [vmem:[#allocation5 + $0x100] sm:$0xff]  ;;  %v816_v14 = vld [vmem:[#allocation5 + $0x108] sm:$0xff] }
 0x123   :  { %v409_v20 = vpop.f32.mrb[3].mxu1  ;;  %v1980_v15 = vpack.c.bf16 %v816_v14, %v815_v12 }
 0x124   :  { %v320_v21 = vadd.f32 %v1433_v17, %v1370_v8  ;;  %v1434_v22 = vpop.f32.mrb[4].mxu0  ;;  %v497_v35 = vmul.f32 %v2431_v18, %v2431_v18 }
 0x125   :  { %v1435_v23 = vpop.f32.mrb[5].mxu0 }
 0x126   :  { %v2433_v24 = vadd.f32 %v1634_v10, %v320_v21  ;;  %v1436_v25 = vadd.f32 %v1435_v23, %v1434_v22  ;;  %v800_v10 = vld [vmem:[#allocation5 + $0x88] sm:$0xff] }
 0x127   :  { %v1948_v11 = vpack.c.bf16 %v800_v10, %v799_v9  ;;  %v805_v9 = vld [vmem:[#allocation5 + $0xb0] sm:$0xff]  ;;  %v806_v10 = vld [vmem:[#allocation5 + $0xb8] sm:$0xff] }
 0x128   :  { %v1437_v27 = vpop.f32.mrb[6].mxu0  ;;  %v325_v28 = vadd.f32 %v1436_v25, %v1370_v8  ;;  %v498_v31 = vmul.f32 %v2433_v24, %v2433_v24  ;;  %v418_v34 = vadd.f32 %v2433_v24, %v2431_v18  ;;  %v1960_v14 = vpack.c.bf16 %v806_v10, %v805_v9  ;;  %v797_v10 = vld [vmem:[#allocation5 + $0x70] sm:$0xff] }
 0x129   :  { %v1438_v29 = vpop.f32.mrb[7].mxu0 }
 0x12a   :  { %v1439_v32 = vadd.f32 %v1438_v29, %v1437_v27  ;;  %v2437_v33 = vadd.f32 %v409_v20, %v325_v28  ;;  %v501_v40 = vadd.f32 %v498_v31, %v497_v35  ;;  %v783_v29 = vld [vmem:[#allocation5] sm:$0xff]  ;;  %v784_v31 = vld [vmem:[#allocation5 + $0x8] sm:$0xff]  ;;  %v802_v35 = vld [vmem:[#allocation5 + $0x98] sm:$0xff] }
 0x12c   :  { %v330_v36 = vadd.f32 %v1439_v32, %v1370_v8  ;;  %v499_v38 = vmul.f32 %v2437_v33, %v2437_v33  ;;  %v419_v42 = vadd.f32 %v418_v34, %v2437_v33  ;;  %v2458_v8 = vld [vmem:[%s2595_s10] sm:$0xff]  ;;  %v801_v34 = vld [vmem:[#allocation5 + $0x90] sm:$0xff] }
 0x12d   :  { %v142_v32 = vld [vmem:[%s2588_s3] sm:$0x1] }
 0x12e   :  { %v2445_v41 = vadd.f32 %v1637_v19, %v330_v36  ;;  %v502_v50 = vadd.f32 %v501_v40, %v499_v38  ;;  %v143_v38 = vld [vmem:[%s2589_s4] sm:$0x1]  ;;  %v1950_v40 = vpack.c.bf16 %v784_v31, %v783_v29  ;;  %v792_v29 = vld [vmem:[#allocation5 + $0x48] sm:$0xff] }
 0x12f   :  { %v823_v31 = vld [vmem:[#allocation5 + $0x140] sm:$0xff] }
 0x130   :  { %v500_v45 = vmul.f32 %v2445_v41, %v2445_v41  ;;  %v420_v47 = vadd.f32 %v419_v42, %v2445_v41 }
 0x132   :  { %v421_v51 = vrot.slane %v420_v47, 4  ;;  %v503_v54 = vadd.f32 %v502_v50, %v500_v45  ;;  %v1952_v45 = vpack.c.bf16 %v802_v35, %v801_v34  ;;  %v786_v50 = vld [vmem:[#allocation5 + $0x18] sm:$0xff] }
 0x134   :  { %v422_v55 = vadd.f32 %v421_v51, %v420_v47  ;;  %v504_v57 = vrot.slane %v503_v54, 4  ;;  %v785_v47 = vld [vmem:[#allocation5 + $0x10] sm:$0xff] }
 0x135   :  { %v817_v51 = vld [vmem:[#allocation5 + $0x110] sm:$0xff] }
 0x136   :  { %v423_v58 = vrot.slane %v422_v55, 2  ;;  %v505_v60 = vadd.f32 %v504_v57, %v503_v54  ;;  %v818_v54 = vld [vmem:[#allocation5 + $0x118] sm:$0xff]  ;;  %v804_v57 = vld [vmem:[#allocation5 + $0xa8] sm:$0xff] }
 0x138   :  { %v424_v61 = vadd.f32 %v423_v58, %v422_v55  ;;  %v506_v63 = vrot.slane %v505_v60, 2  ;;  %v803_v55 = vld [vmem:[#allocation5 + $0xa0] sm:$0xff] }
 0x13a   :  { %v425_v0 = vrot.slane %v424_v61, 1  ;;  %v507_v2 = vadd.f32 %v506_v63, %v505_v60  ;;  %v1954_v60 = vpack.c.bf16 %v786_v50, %v785_v47  ;;  %v1984_v63 = vpack.c.bf16 %v818_v54, %v817_v51  ;;  %v825_v47 = vld [vmem:[#allocation5 + $0x150] sm:$0xff]  ;;  %v826_v51 = vld [vmem:[#allocation5 + $0x158] sm:$0xff] }
 0x13b   :  { %v2000_v54 = vpack.c.bf16 %v826_v51, %v825_v47 }
 0x13c   :  { %v426_v3 = vadd.f32 %v425_v0, %v424_v61  ;;  %v508_v6 = vrot.slane %v507_v2, 1  ;;  %v1956_v0 = vpack.c.bf16 %v804_v57, %v803_v55  ;;  %v811_v55 = vld [vmem:[#allocation5 + $0xe0] sm:$0xff]  ;;  %v812_v57 = vld [vmem:[#allocation5 + $0xe8] sm:$0xff] }
 0x13e   :  { %1671 = vmatmul.mubr.f32.vlgmr.msra.gmra.mrb[8].mxu0 %v426_v3  ;;  %v509_v7 = vadd.f32 %v508_v6, %v507_v2  ;;  %v787_v2 = vld [vmem:[#allocation5 + $0x20] sm:$0xff]  ;;  %v788_v3 = vld [vmem:[#allocation5 + $0x28] sm:$0xff] }
 0x13f   :  { %1710 = vmatprep.mubr.msk.f32.mxu0 %vm2149_vm6, %v2150_v5  ;;  %1709 = vmatpush3.msra.mxu0 %v2458_v8  ;;  %v819_v6 = vld [vmem:[#allocation5 + $0x120] sm:$0xff] }
 0x140   :  { %1706 = vmatmul.mubr.f32.vlgmr.msra.gmra.mrb[4].mxu1 %v509_v7  ;;  %1949 = vmatprep.subr.bf16.mxu0 %v1948_v11  ;;  %v820_v7 = vld [vmem:[#allocation5 + $0x128] sm:$0xff]  ;;  %v1958_v11 = vpack.c.bf16 %v788_v3, %v787_v2 }
 0x141   :  { %1715 = vmatprep.mubr.msk.f32.mxu1 %vm2149_vm6, %v2150_v5  ;;  %1714 = vmatpush3.msra.mxu1 %v2458_v8  ;;  %v1988_v12 = vpack.c.bf16 %v820_v7, %v819_v6  ;;  %v828_v2 = vld [vmem:[#allocation5 + $0x168] sm:$0xff]  ;;  %v813_v6 = vld [vmem:[#allocation5 + $0xf0] sm:$0xff]  ;;  %v814_v7 = vld [vmem:[#allocation5 + $0xf8] sm:$0xff] }
 0x142   :  { %1981 = vmatprep.subr.bf16.mxu1 %v1980_v15  ;;  %v1976_v9 = vpack.c.bf16 %v814_v7, %v813_v6 }
 0x211   :  { %v493_v17 = vpop.f32.mrb[8].mxu0 }
 0x212   :  { %v580_v19 = vmul.f32 0.001953125, %v493_v17  ;;  %v1672_v20 = vpop.f32.mrb[9].mxu0  ;;  %v789_v17 = vld [vmem:[#allocation5 + $0x30] sm:$0xff] }
 0x213   :  { %v576_v21 = vpop.f32.mrb[4].mxu1  ;;  %v821_v20 = vld [vmem:[#allocation5 + $0x130] sm:$0xff] }
 0x214   :  { %v582_v22 = vmul.f32 %v580_v19, %v580_v19  ;;  %v581_v23 = vmul.f32 0.001953125, %v576_v21  ;;  %v1707_v25 = vpop.f32.mrb[5].mxu1  ;;  %v822_v21 = vld [vmem:[#allocation5 + $0x138] sm:$0xff] }
 0x216   :  { %v583_v27 = vsub.f32 %v581_v23, %v582_v22  ;;  %v807_v22 = vld [vmem:[#allocation5 + $0xc0] sm:$0xff]  ;;  %v808_v23 = vld [vmem:[#allocation5 + $0xc8] sm:$0xff] }
 0x218   :  { %v584_v28 = vadd.f32 1e-05, %v583_v27  ;;  %v1992_v27 = vpack.c.bf16 %v822_v21, %v821_v20  ;;  %v2473_v20 = vsub.s32 0, %v2242_v46 }
 0x21a   :  { %2068 = vrsqrt.f32 %v584_v28  ;;  %v1964_v28 = vpack.c.bf16 %v808_v23, %v807_v22 }
 0x224   :  { %v2069_v36 = vpop.eup %2068 }
 0x225   :  { %v586_v42 = vmul.f32 %v2069_v36, %v142_v32  ;;  %v824_v32 = vld [vmem:[#allocation5 + $0x148] sm:$0xff]  ;;  %v809_v36 = vld [vmem:[#allocation5 + $0xd0] sm:$0xff] }
 0x226   :  { %v1996_v35 = vpack.c.bf16 %v824_v32, %v823_v31 }
 0x227   :  { %1711 = vmatmul.mubr.msk.f32.vlgmr.msra.gmra.mrb[10].mxu0 %vm589_vm7, %v586_v42  ;;  %v587_v58 = vmul.f32 %v586_v42, %v580_v19  ;;  %v790_v19 = vld [vmem:[#allocation5 + $0x38] sm:$0xff]  ;;  %v793_v42 = vld [vmem:[#allocation5 + $0x50] sm:$0xff] }
 0x228   :  { %1951 = vmatpush3.bf16.msra.mxu0 %v1950_v40  ;;  %v1962_v25 = vpack.c.bf16 %v790_v19, %v789_v17  ;;  %v830_v17 = vld [vmem:[#allocation5 + $0x178] sm:$0xff] }
 0x229   :  { %v588_v61 = vsub.f32 %v143_v38, %v587_v58  ;;  %1953 = vmatprep.subr.bf16.mxu0 %v1952_v45  ;;  %v810_v38 = vld [vmem:[#allocation5 + $0xd8] sm:$0xff]  ;;  %v1972_v58 = vpack.c.bf16 %v812_v57, %v811_v55 }
 0x22a   :  { %v1968_v40 = vpack.c.bf16 %v810_v38, %v809_v36  ;;  %v794_v45 = vld [vmem:[#allocation5 + $0x58] sm:$0xff] }
 0x22b   :  { %1716 = vmatmul.mubr.msk.f32.vlgmr.msra.gmra.mrb[6].mxu1 %vm589_vm7, %v588_v61  ;;  %v1970_v50 = vpack.c.bf16 %v794_v45, %v793_v42  ;;  %v796_v61 = vld [vmem:[#allocation5 + $0x68] sm:$0xff] }
 0x22c   :  { %1983 = vmatpush3.bf16.msra.mxu1 %v1980_v15  ;;  %1955 = vmatpush3.bf16.msra.mxu0 %v1954_v60  ;;  %v791_v15 = vld [vmem:[#allocation5 + $0x40] sm:$0xff] }
 0x22d   :  { %1985 = vmatprep.subr.bf16.mxu1 %v1984_v63  ;;  %1957 = vmatprep.subr.bf16.mxu0 %v1956_v0  ;;  %v1966_v34 = vpack.c.bf16 %v792_v29, %v791_v15  ;;  %v795_v60 = vld [vmem:[#allocation5 + $0x60] sm:$0xff] }
 0x22e   :  { %v1974_v0 = vpack.c.bf16 %v796_v61, %v795_v60 }
 0x230   :  { %1987 = vmatpush3.bf16.msra.mxu1 %v1984_v63  ;;  %1959 = vmatpush3.bf16.msra.mxu0 %v1958_v11  ;;  %v827_v63 = vld [vmem:[#allocation5 + $0x160] sm:$0xff]  ;;  %v798_v11 = vld [vmem:[#allocation5 + $0x78] sm:$0xff] }
 0x231   :  { %1989 = vmatprep.subr.bf16.mxu1 %v1988_v12  ;;  %1961 = vmatprep.subr.bf16.mxu0 %v1960_v14  ;;  %v2004_v3 = vpack.c.bf16 %v828_v2, %v827_v63  ;;  %v1978_v14 = vpack.c.bf16 %v798_v11, %v797_v10 }
 0x234   :  { %1991 = vmatpush3.bf16.msra.mxu1 %v1988_v12  ;;  %1963 = vmatpush3.bf16.msra.mxu0 %v1962_v25  ;;  %v829_v12 = vld [vmem:[#allocation5 + $0x170] sm:$0xff] }
 0x235   :  { %1993 = vmatprep.subr.bf16.mxu1 %v1992_v27  ;;  %1965 = vmatprep.subr.bf16.mxu0 %v1964_v28  ;;  %v2008_v19 = vpack.c.bf16 %v830_v17, %v829_v12 }
 0x238   :  { %1995 = vmatpush3.bf16.msra.mxu1 %v1992_v27  ;;  %1967 = vmatpush3.bf16.msra.mxu0 %v1966_v34 }
 0x239   :  { %1997 = vmatprep.subr.bf16.mxu1 %v1996_v35  ;;  %1969 = vmatprep.subr.bf16.mxu0 %v1968_v40 }
 0x23c   :  { %1999 = vmatpush3.bf16.msra.mxu1 %v1996_v35  ;;  %1971 = vmatpush3.bf16.msra.mxu0 %v1970_v50 }
 0x23d   :  { %2001 = vmatprep.subr.bf16.mxu1 %v2000_v54  ;;  %1973 = vmatprep.subr.bf16.mxu0 %v1972_v58 }
 0x240   :  { %2003 = vmatpush3.bf16.msra.mxu1 %v2000_v54  ;;  %1975 = vmatpush3.bf16.msra.mxu0 %v1974_v0 }
 0x241   :  { %2005 = vmatprep.subr.bf16.mxu1 %v2004_v3  ;;  %1977 = vmatprep.subr.bf16.mxu0 %v1976_v9 }
 0x244   :  { %2007 = vmatpush3.bf16.msra.mxu1 %v2004_v3  ;;  %1979 = vmatpush3.bf16.msra.mxu0 %v1978_v14 }
 0x245   :  { %2009 = vmatprep.subr.bf16.mxu1 %v2008_v19  ;;  %2012 = vmatprep.subr.bf16.mxu0 %v2148_v44 }
 0x248   :  { %2011 = vmatpush3.bf16.msra.mxu1 %v2008_v19 }
 0x249   :  { %2036 = vmatprep.subr.bf16.mxu1 %v2148_v44 }
 0x2fa   :  { %v659_v21 = vpop.f32.mrb[10].mxu0 }
 0x2fb   :  { %v739_v22 = vrot.slane %v659_v21, %v2473_v20  ;;  %v1712_v23 = vpop.f32.mrb[11].mxu0 }
 0x2fd   :  { %v741_v25 = vmul.f32 %v739_v22, %v2433_v24  ;;  %v742_v28 = vmul.f32 %v739_v22, %v2437_v33  ;;  %v743_v15 = vmul.f32 %v739_v22, %v2445_v41  ;;  %v740_v32 = vmul.f32 %v739_v22, %v2431_v18 }
 0x2fe   :  { %v732_v27 = vpop.f32.mrb[6].mxu1 }
 0x2ff   :  { %v747_v29 = vrot.slane %v732_v27, %v2473_v20  ;;  %v1717_v31 = vpop.f32.mrb[7].mxu1 }
 0x301   :  { %v749_v34 = vadd.f32 %v747_v29, %v741_v25  ;;  %v750_v35 = vadd.f32 %v747_v29, %v742_v28  ;;  %v751_v36 = vadd.f32 %v747_v29, %v743_v15  ;;  %v748_v38 = vadd.f32 %v747_v29, %v740_v32 }
 0x303   :  { %v753_v40 = vmax.f32 %v749_v34, 0.0  ;;  %v754_v42 = vmax.f32 %v750_v35, 0.0  ;;  %v755_v45 = vmax.f32 %v751_v36, 0.0  ;;  %v752_v47 = vmax.f32 %v748_v38, 0.0 }
 0x305   :  { %v759_v50 = vrot.slane %v752_v47, 7  ;;  %901 = vmatprep.mubr.f32.mxu0 %v752_v47  ;;  %v762_v24 = vrot.slane %v755_v45, 7  ;;  %v771_v51 = vrot.slane %v752_v47, 1  ;;  %v772_v33 = vrot.slane %v753_v40, 1 }
 0x306   :  { %v773_v54 = vrot.slane %v754_v42, 1  ;;  %v774_v41 = vrot.slane %v755_v45, 1  ;;  %v760_v55 = vrot.slane %v753_v40, 7  ;;  %v761_v57 = vrot.slane %v754_v42, 7 }
 0x307   :  { %v766_v18 = vsel %vm152_vm1, %v762_v24, %v759_v50  ;;  %v777_v58 = vsel %vm177_vm0, %v771_v51, %v772_v33 }
 0x308   :  { %1383 = vmatmul.mubr.msk.f32.vlgmr.msra.gmra.mrb[12].mxu0 %vm2282_vm2, %v766_v18  ;;  %1750 = vmatprep.mubr.f32.mxu1 %v777_v58  ;;  %v776_v60 = vsel %vm177_vm0, %v772_v33, %v773_v54  ;;  %v775_v61 = vsel %vm177_vm0, %v773_v54, %v774_v41  ;;  %v765_v63 = vsel %vm152_vm1, %v759_v50, %v760_v55 }
 0x309   :  { %906 = vmatprep.mubr.f32.mxu0 %v753_v40  ;;  %1751 = vmatmul.mubr.msk.f32.vlgmr.msra.gmra.mrb[8].mxu1 %vm2290_vm3, %v776_v60  ;;  %v778_v0 = vsel %vm177_vm0, %v774_v41, %v771_v51  ;;  %v764_v26 = vsel %vm152_vm1, %v760_v55, %v761_v57  ;;  %v763_v2 = vsel %vm152_vm1, %v761_v57, %v762_v24 }
 0x30a   :  { %1753 = vmatprep.mubr.f32.mxu1 %v775_v61  ;;  %2014 = vmatpush3.bf16.msra.mxu0 %v2332_v43 }
 0x30b   :  { %2038 = vmatpush3.bf16.msra.mxu1 %v2332_v43  ;;  %2015 = vmatprep.subr.bf16.mxu0 %v2148_v44 }
 0x30c   :  { %907 = vmatmul.mubr.f32.gmra.mrb[14].mxu0 %v765_v63  ;;  %2039 = vmatprep.subr.bf16.mxu1 %v2148_v44 }
 0x30d   :  { %911 = vmatprep.mubr.f32.mxu0 %v754_v42  ;;  %1754 = vmatmul.mubr.msk.f32.gmra.mrb[10].mxu1 %vm2308_vm4, %v778_v0 }
 0x30e   :  { %2017 = vmatpush3.bf16.msra.mxu0 %v2346_v49  ;;  %1823 = vmatprep.mubr.msk.f32.mxu1 %vm2149_vm6, %v2150_v5 }
 0x30f   :  { %2041 = vmatpush3.bf16.msra.mxu1 %v2346_v49  ;;  %2018 = vmatprep.subr.bf16.mxu0 %v2148_v44 }
 0x310   :  { %1385 = vmatmul.mubr.msk.f32.gmra.mrb[16].mxu0 %vm2315_vm5, %v764_v26  ;;  %2042 = vmatprep.subr.bf16.mxu1 %v2148_v44 }
 0x311   :  { %916 = vmatprep.mubr.f32.mxu0 %v755_v45 }
 0x312   :  { %2020 = vmatpush3.bf16.msra.mxu0 %v2358_v53 }
 0x313   :  { %2044 = vmatpush3.bf16.msra.mxu1 %v2358_v53  ;;  %2021 = vmatprep.subr.bf16.mxu0 %v2148_v44 }
 0x314   :  { %917 = vmatmul.mubr.f32.gmra.mrb[18].mxu0 %v763_v2  ;;  %2045 = vmatprep.subr.bf16.mxu1 %v2148_v44  ;;  %v757_v2 = vld [vmem:[%s2592_s7] sm:$0x1]  ;;  %s2151_s7 = smov [#allocation7]  }
 0x315   :  { %1788 = vmatprep.mubr.msk.f32.mxu0 %vm2149_vm6, %v2150_v5 }
 0x316   :  { %2023 = vmatpush3.bf16.msra.mxu0 %v2370_v56 }
 0x317   :  { %2047 = vmatpush3.bf16.msra.mxu1 %v2370_v56  ;;  %2024 = vmatprep.subr.bf16.mxu0 %v2148_v44 }
 0x318   :  { %2048 = vmatprep.subr.bf16.mxu1 %v2148_v44 }
 0x31a   :  { %2026 = vmatpush3.bf16.msra.mxu0 %v2382_v59 }
 0x31b   :  { %2050 = vmatpush3.bf16.msra.mxu1 %v2382_v59  ;;  %2027 = vmatprep.subr.bf16.mxu0 %v2148_v44 }
 0x31c   :  { %2051 = vmatprep.subr.bf16.mxu1 %v2148_v44 }
 0x31e   :  { %2029 = vmatpush3.bf16.msra.mxu0 %v2394_v62 }
 0x31f   :  { %2053 = vmatpush3.bf16.msra.mxu1 %v2394_v62  ;;  %2030 = vmatprep.subr.bf16.mxu0 %v2148_v44 }
 0x320   :  { %2054 = vmatprep.subr.bf16.mxu1 %v2148_v44 }
 0x322   :  { %2032 = vmatpush3.bf16.msra.mxu0 %v2406_v1 }
 0x323   :  { %2056 = vmatpush3.bf16.msra.mxu1 %v2406_v1  ;;  %2033 = vmatprep.subr.bf16.mxu0 %v2148_v44 }
 0x324   :  { %2057 = vmatprep.subr.bf16.mxu1 %v2148_v44 }
 0x326   :  { %2035 = vmatpush3.bf16.msra.mxu0 %v2418_v4 }
 0x327   :  { %2059 = vmatpush3.bf16.msra.mxu1 %v2418_v4  ;;  %1826 = vmatprep.subr.mxu0 %v2150_v5 }
 0x328   :  { %1831 = vmatprep.subr.mxu1 %v2150_v5 }
 0x3db   :  { %v1530_v46 = vpop.f32.mrb[12].mxu0 }
 0x3dc   :  { %v1531_v30 = vpop.f32.mrb[13].mxu0  ;;  %v1752_v37 = vpop.f32.mrb[8].mxu1 }
 0x3dd   :  { %v1532_v43 = vadd.f32 %v1531_v30, %v1530_v46  ;;  %v988_v49 = vpop.f32.mrb[9].mxu1 }
 0x3df   :  { %v904_v53 = vadd.f32 %v1532_v43, %v1381_v39  ;;  %v1533_v56 = vpop.f32.mrb[14].mxu0 }
 0x3e0   :  { %v1534_v44 = vpop.f32.mrb[15].mxu0  ;;  %v1755_v59 = vpop.f32.mrb[10].mxu1 }
 0x3e1   :  { %v2544_v62 = vadd.f32 %v988_v49, %v904_v53  ;;  %v1535_v1 = vadd.f32 %v1534_v44, %v1533_v56  ;;  %v998_v4 = vpop.f32.mrb[11].mxu1 }
 0x3e3   :  { %v909_v3 = vadd.f32 %v1535_v1, %v1381_v39  ;;  %v1536_v6 = vpop.f32.mrb[16].mxu0  ;;  %v1086_v22 = vmul.f32 %v2544_v62, %v2544_v62 }
 0x3e4   :  { %v1537_v7 = vpop.f32.mrb[17].mxu0 }
 0x3e5   :  { %v994_v9 = vadd.f32 %v1752_v37, %v909_v3  ;;  %v1538_v10 = vadd.f32 %v1537_v7, %v1536_v6 }
 0x3e7   :  { %v914_v11 = vadd.f32 %v1538_v10, %v1381_v39  ;;  %v1539_v12 = vpop.f32.mrb[18].mxu0  ;;  %v1087_v17 = vmul.f32 %v994_v9, %v994_v9  ;;  %v1007_v23 = vadd.f32 %v994_v9, %v2544_v62 }
 0x3e8   :  { %v1540_v14 = vpop.f32.mrb[19].mxu0 }
 0x3e9   :  { %v999_v19 = vadd.f32 %v998_v4, %v914_v11  ;;  %v1541_v21 = vadd.f32 %v1540_v14, %v1539_v12  ;;  %v1090_v28 = vadd.f32 %v1087_v17, %v1086_v22 }
 0x3eb   :  { %v1088_v25 = vmul.f32 %v999_v19, %v999_v19  ;;  %v919_v27 = vadd.f32 %v1541_v21, %v1381_v39  ;;  %v1008_v15 = vadd.f32 %v1007_v23, %v999_v19 }
 0x3ed   :  { %v1004_v29 = vadd.f32 %v1755_v59, %v919_v27  ;;  %v1091_v31 = vadd.f32 %v1090_v28, %v1088_v25 }
 0x3ef   :  { %v1009_v32 = vadd.f32 %v1008_v15, %v1004_v29  ;;  %v1089_v34 = vmul.f32 %v1004_v29, %v1004_v29 }
 0x3f1   :  { %v1010_v35 = vrot.slane %v1009_v32, 4  ;;  %v1092_v36 = vadd.f32 %v1091_v31, %v1089_v34 }
 0x3f3   :  { %v1011_v38 = vadd.f32 %v1010_v35, %v1009_v32  ;;  %v1093_v40 = vrot.slane %v1092_v36, 4 }
 0x3f5   :  { %v1012_v42 = vrot.slane %v1011_v38, 2  ;;  %v1094_v45 = vadd.f32 %v1093_v40, %v1092_v36 }
 0x3f7   :  { %v1013_v47 = vadd.f32 %v1012_v42, %v1011_v38  ;;  %v1095_v50 = vrot.slane %v1094_v45, 2 }
 0x3f9   :  { %v1014_v24 = vrot.slane %v1013_v47, 1  ;;  %v1096_v51 = vadd.f32 %v1095_v50, %v1094_v45 }
 0x3fb   :  { %v1015_v33 = vadd.f32 %v1014_v24, %v1013_v47  ;;  %v1097_v54 = vrot.slane %v1096_v51, 1 }
 0x3fd   :  { %1789 = vmatmul.mubr.f32.vlgmr.msra.gmra.mrb[20].mxu0 %v1015_v33  ;;  %v1098_v41 = vadd.f32 %v1097_v54, %v1096_v51 }
 0x3fe   :  { %1827 = vmatpush3.msra.mxu0 %v2458_v8  ;;  %1828 = vmatprep.mubr.msk.f32.mxu0 %vm2149_vm6, %v2150_v5 }
 0x3ff   :  { %1824 = vmatmul.mubr.f32.vlgmr.msra.gmra.mrb[12].mxu1 %v1098_v41 }
 0x400   :  { %1832 = vmatpush3.msra.mxu1 %v2458_v8  ;;  %1833 = vmatprep.mubr.msk.f32.mxu1 %vm2149_vm6, %v2150_v5  ;;  %v758_v5 = vld [vmem:[%s2593_s8] sm:$0x1]  ;;  %s1357_s8 = sshll.u32 %s2151_s7, 4  ;;  %s1358_s8 = int_to_ptr.vmem [resolvable:$true] %s1357_s8 }
 0x401   :  { %s2116_s0 = scalar_lea.vmem %s1358_s8, 512  ;;  %p2121_p3 = scmp.lt.s32.totalorder %s1358_s8, %s1358_s8 }
 0x402   :  { %p2117_p2 = scmp.ne.s32.totalorder %s1358_s8, %s2116_s0  ;;  %p2122_p4 = scmp.lt.s32.totalorder %s2116_s0, %s2116_s0 }
 0x404   :  { %p2123_p5 = por %p2122_p4, %p2121_p3 }
 0x406   :  { %p2124_p6 = pnand %p2123_p5, %p2117_p2 }
 0x4d0   :  { %v1082_v55 = vpop.f32.mrb[20].mxu0 }
 0x4d1   :  { %v1169_v57 = vmul.f32 0.001953125, %v1082_v55  ;;  %v1790_v18 = vpop.f32.mrb[21].mxu0 }
 0x4d2   :  { %v1165_v58 = vpop.f32.mrb[12].mxu1 }
 0x4d3   :  { %v1171_v60 = vmul.f32 %v1169_v57, %v1169_v57  ;;  %v1170_v61 = vmul.f32 0.001953125, %v1165_v58  ;;  %v1825_v63 = vpop.f32.mrb[13].mxu1 }
 0x4d5   :  { %v1172_v0 = vsub.f32 %v1170_v61, %v1171_v60 }
 0x4d7   :  { %v1173_v26 = vadd.f32 1e-05, %v1172_v0 }
 0x4d9   :  { %2070 = vrsqrt.f32 %v1173_v26 }
 0x4e3   :  { %v2071_v46 = vpop.eup %2070 }
 0x4e4   :  { %v1175_v30 = vmul.f32 %v2071_v46, %v757_v2 }
 0x4e6   :  { %1829 = vmatmul.mubr.msk.f32.vlgmr.msra.gmra.mrb[22].mxu0 %vm589_vm7, %v1175_v30  ;;  %v1176_v8 = vmul.f32 %v1175_v30, %v1169_v57 }
 0x4e8   :  { %v1177_v37 = vsub.f32 %v758_v5, %v1176_v8 }
 0x4ea   :  { %1834 = vmatmul.mubr.msk.f32.vlgmr.msra.gmra.mrb[14].mxu1 %vm589_vm7, %v1177_v37 }
 0x5b9   :  { %v1247_v39 = vpop.f32.mrb[22].mxu0 }
 0x5ba   :  { %v1327_v43 = vrot.slane %v1247_v39, %v2473_v20  ;;  %v1830_v49 = vpop.f32.mrb[23].mxu0 }
 0x5bc   :  { %v1328_v53 = vmul.f32 %v1327_v43, %v2544_v62  ;;  %v1329_v44 = vmul.f32 %v1327_v43, %v994_v9  ;;  %v1330_v59 = vmul.f32 %v1327_v43, %v999_v19  ;;  %v1331_v1 = vmul.f32 %v1327_v43, %v1004_v29 }
 0x5bd   :  { %v1320_v56 = vpop.f32.mrb[14].mxu1 }
 0x5be   :  { %v1335_v4 = vrot.slane %v1320_v56, %v2473_v20  ;;  %v1835_v3 = vpop.f32.mrb[15].mxu1 }
 0x5c0   :  { %v1336_v6 = vadd.f32 %v1335_v4, %v1328_v53  ;;  %v1337_v7 = vadd.f32 %v1335_v4, %v1329_v44  ;;  %v1338_v10 = vadd.f32 %v1335_v4, %v1330_v59  ;;  %v1339_v11 = vadd.f32 %v1335_v4, %v1331_v1 }
 0x5c2   :  { %v1340_v12 = vadd.f32 %v1336_v6, %v2247_v48  ;;  %v1341_v14 = vadd.f32 %v1337_v7, %v2253_v52  ;;  %v1342_v17 = vadd.f32 %v1338_v10, %v2271_v16  ;;  %v1343_v62 = vadd.f32 %v1339_v11, %v2265_v13 }
 0x5c4   :  { %v1344_v9 = vmax.f32 %v1340_v12, 0.0  ;;  %v1345_v19 = vmax.f32 %v1341_v14, 0.0  ;;  %v1346_v21 = vmax.f32 %v1342_v17, 0.0  ;;  %v1347_v22 = vmax.f32 %v1343_v62, 0.0 }
 0x5c6   :  { %1348 = vst [vmem:[#allocation7] sm:$0xff] %v1344_v9  ;;  %1349 = vst [vmem:[#allocation7 + $0x8] sm:$0xff] %v1345_v19 }
 0x5c7   :  { %1350 = vst [vmem:[#allocation7 + $0x10] sm:$0xff] %v1346_v21  ;;  %1351 = vst [vmem:[#allocation7 + $0x18] sm:$0xff] %v1347_v22 }
 0x5c8   :  { %2127 = shalt.err (!%p2124_p6)
}
 0x5c9   :  { %s2128_s15 = scalar_lea.hbm %s2596_s11, 512 }
 0x5ca   :  { %p2129_p7 = scmp.ne.s32.totalorder %s2596_s11, %s2128_s15  ;;  %p2132_p8 = scmp.lt.u32.totalorder %s2128_s15, %s2596_s11 }
 0x5cc   :  { %p2134_p9 = pnand %p2132_p8, %p2129_p7 }
 0x5ce   :  { %2137 = shalt.err (!%p2134_p9)
}
 0x5cf   :  { %1363 = dma.vmem_to_hbm [thread:$0]  %s1358_s8, 512, %s2596_s11, [#allocation4], %s2145_s27, %s2145_s27, %s2146_s28  }
 0x5d0   :  { %2142 = dma.done.wait [#allocation4], 512  }
 0x5d1   :  { %2143 = vsyncadd [#allocation4], 4294966784 }
 0x5d2   :  { %1367 = vsyncpa [#allocation3], 1 }
 0x5d3   :  { %1368 = vsyncpa [#allocation6], 1 }
 0x5d4   :  { %1369 = vsyncpa [#allocation4], 1 }

</bundles_post_ra>
